<compile_context>
chip_gen: v7x
topology: tpu7x:2x2x1
jax: 0.10.0
libtpu: 0.0.40
codegen_flags: <defaults>
</compile_context>

<pallas_src>
import jax
import jax.numpy as jnp
from jax.experimental import pallas as pl
from jax.experimental.pallas import tpu as pltpu

# ---------------- config (small but TPU-friendly shapes) ----------------
BATCH = 2
CH = 128                 # feature_channels  (multiple of 8 -> clean sublane tiling)
RED = 16                 # reduction_ratio (module default)
CMID = CH // RED         # bottleneck channels = 8
H, W = 16, 16            # spatial size; H*W = 256 is a multiple of 128 (lane-dense)


# ---------------- fused kernel (one batch element per grid step) ----------------
def _channel_attention_kernel(x_ref, w1_ref, b1_ref, w2_ref, b2_ref, o_ref):
    # x_ref: (1, C, HW) -- one batch element; C on sublanes, HW on lanes.
    x = x_ref[...]                                              # (1, C, HW)

    # nn.AdaptiveAvgPool2d(1): lane (XLU) reduction.  The 1/(H*W) factor is
    # pre-folded into w1, so a plain sum suffices here.
    pooled = jnp.sum(x[0], axis=-1, keepdims=True)              # (C, 1), C on sublanes

    # nn.Conv2d(C, C//r, 1) + bias, then nn.ReLU -- computed in the transposed
    # (C-on-sublanes) orientation so no relayout is needed before or after.
    h = jnp.dot(w1_ref[...], pooled,
                preferred_element_type=jnp.float32) + b1_ref[...]   # (Cmid, 1)
    h = jnp.maximum(h, 0.0)

    # nn.Conv2d(C//r, C, 1) + bias, then nn.Sigmoid
    y = jnp.dot(w2_ref[...], h,
                preferred_element_type=jnp.float32) + b2_ref[...]   # (C, 1)
    cw = jax.nn.sigmoid(y)                                      # (C, 1)

    # features * channel_weights: broadcast the per-channel scalar across HW lanes.
    o_ref[...] = x * cw[None, :, :]                             # (1, C, HW)


# ---------------- wrapper ----------------
def channel_attention(x_nchw, w1, b1, w2, b2):
    """x_nchw: (B, C, H, W) float32.  Returns (B, C, H, W), matching the module."""
    b, c, h, w = x_nchw.shape
    hw = h * w

    # VMEM guard (v7x scoped default is 32 MiB; double-buffered x + out tiles).
    per_elem_bytes = 4 * c * hw
    assert 2 * 2 * per_elem_bytes < 32 * 1024 * 1024, (
        "per-batch-element tile too large for the gridless-in-C/HW design; "
        "add C/HW tiling and set vmem_limit_bytes")

    x3 = x_nchw.reshape(b, c, hw)                   # contiguous reshape, no transpose
    out = pl.pallas_call(
        _channel_attention_kernel,
        out_shape=jax.ShapeDtypeStruct((b, c, hw), jnp.float32),
        grid=(b,),
        in_specs=[
            pl.BlockSpec((1, c, hw), lambda i: (i, 0, 0)),   # x: one batch element
            pl.BlockSpec(w1.shape, lambda i: (0, 0)),        # weights: resident
            pl.BlockSpec(b1.shape, lambda i: (0, 0)),
            pl.BlockSpec(w2.shape, lambda i: (0, 0)),
            pl.BlockSpec(b2.shape, lambda i: (0, 0)),
        ],
        out_specs=pl.BlockSpec((1, c, hw), lambda i: (i, 0, 0)),
        compiler_params=pltpu.CompilerParams(
            dimension_semantics=("parallel",),               # megacore split on v7x
        ),
    )(x3, w1, b1, w2, b2)
    return out.reshape(b, c, h, w)


# ---------------- parameter setup (torch-native shapes -> kernel layout) ----------------
def init_torch_style_params(key):
    k1, k2, k3, k4 = jax.random.split(key, 4)
    # PyTorch Conv2d weight shapes: (out_ch, in_ch, 1, 1); bias: (out_ch,)
    return dict(
        conv1_w=(0.05 * jax.random.normal(k1, (CMID, CH, 1, 1))).astype(jnp.float32),
        conv1_b=(0.05 * jax.random.normal(k2, (CMID,))).astype(jnp.float32),
        conv2_w=(0.05 * jax.random.normal(k3, (CH, CMID, 1, 1))).astype(jnp.float32),
        conv2_b=(0.05 * jax.random.normal(k4, (CH,))).astype(jnp.float32),
    )


def prepare_kernel_params(p, spatial_size):
    # 1x1 conv on a 1x1 map == channel matmul.  Keep torch's (out, in) orientation so
    # the FC chain runs with C on sublanes (no .T, no in-kernel relayouts), and fold
    # the average pool's 1/(H*W) into w1 (one-time host-side preprocessing).
    w1 = (p['conv1_w'][:, :, 0, 0] * (1.0 / spatial_size)).astype(jnp.float32)  # (Cmid, C)
    b1 = p['conv1_b'].reshape(CMID, 1)
    w2 = p['conv2_w'][:, :, 0, 0].astype(jnp.float32)                           # (C, Cmid)
    b2 = p['conv2_b'].reshape(CH, 1)
    return w1, b1, w2, b2


# ---------------- pure-JAX reference (numerical check against torch semantics) ----------------
def reference(x_nchw, p):
    pooled = jnp.mean(x_nchw, axis=(2, 3))                       # (B, C)
    w1 = p['conv1_w'][:, :, 0, 0]; b1 = p['conv1_b']
    w2 = p['conv2_w'][:, :, 0, 0]; b2 = p['conv2_b']
    h = jnp.maximum(pooled @ w1.T + b1, 0.0)
    cw = jax.nn.sigmoid(h @ w2.T + b2)                           # (B, C)
    return x_nchw * cw[:, :, None, None]


if __name__ == "__main__":
    key = jax.random.PRNGKey(0)
    pkey, xkey = jax.random.split(key)

    params = init_torch_style_params(pkey)
    w1, b1, w2, b2 = prepare_kernel_params(params, H * W)

    x = jax.random.normal(xkey, (BATCH, CH, H, W), jnp.float32)

    out = jax.jit(channel_attention)(x, w1, b1, w2, b2)
    out = jax.block_until_ready(out)

    assert out.shape == (BATCH, CH, H, W), out.shape
    assert bool(jnp.all(jnp.isfinite(out)))

    ref = reference(x, params)
    err = float(jnp.max(jnp.abs(out - ref)))
    assert err < 1e-5, err

    print("KERNEL_OK")
</pallas_src>

<mosaic_0001>
module attributes {stable_mosaic.version = 11 : i64} {
  func.func @_channel_attention_kernel(%arg0: i32, %arg1: memref<1x128x256xf32, #tpu.memory_space<vmem>>, %arg2: memref<8x128xf32, #tpu.memory_space<vmem>>, %arg3: memref<8x1xf32, #tpu.memory_space<vmem>>, %arg4: memref<128x8xf32, #tpu.memory_space<vmem>>, %arg5: memref<128x1xf32, #tpu.memory_space<vmem>>, %arg6: memref<1x128x256xf32, #tpu.memory_space<vmem>>) attributes {dimension_semantics = [#tpu.dimension_semantics<parallel>], iteration_bounds = array<i64: 2>, scalar_prefetch = 0 : i64, scratch_operands = 0 : i64, tpu.core_type = #tpu.core_type<tc>, window_params = [{transform_indices = @transform_0, window_bounds = array<i64: 1, 128, 256>}, {pipeline_mode = #tpu.pipeline_mode<synchronous>, transform_indices = @transform_1, window_bounds = array<i64: 8, 128>}, {pipeline_mode = #tpu.pipeline_mode<synchronous>, transform_indices = @transform_2, window_bounds = array<i64: 8, 1>}, {pipeline_mode = #tpu.pipeline_mode<synchronous>, transform_indices = @transform_3, window_bounds = array<i64: 128, 8>}, {pipeline_mode = #tpu.pipeline_mode<synchronous>, transform_indices = @transform_4, window_bounds = array<i64: 128, 1>}, {transform_indices = @transform_5, window_bounds = array<i64: 1, 128, 256>}]} {
    %c0 = arith.constant 0 : index
    %c0_0 = arith.constant 0 : index
    %c0_1 = arith.constant 0 : index
    %0 = vector.load %arg1[%c0, %c0_0, %c0_1] : memref<1x128x256xf32, #tpu.memory_space<vmem>>, vector<1x128x256xf32>
    %1 = vector.shape_cast %0 : vector<1x128x256xf32> to vector<128x256xf32>
    %cst = arith.constant dense<0.000000e+00> : vector<128xf32>
    %2 = vector.multi_reduction <add>, %1, %cst [1] : vector<128x256xf32> to vector<128xf32>
    %3 = vector.shape_cast %2 : vector<128xf32> to vector<128x1xf32>
    %c0_2 = arith.constant 0 : index
    %c0_3 = arith.constant 0 : index
    %4 = vector.load %arg2[%c0_2, %c0_3] : memref<8x128xf32, #tpu.memory_space<vmem>>, vector<8x128xf32>
    %cst_4 = arith.constant dense<0.000000e+00> : vector<8x1xf32>
    %5 = tpu.matmul %4, %3, %cst_4 {dimension_numbers = #tpu.dot_dimension_numbers<[1], [0], [0], [1], [0, 0, 1, 1], [], []>} : vector<8x128xf32>, vector<128x1xf32>, vector<8x1xf32> -> vector<8x1xf32>
    %c0_5 = arith.constant 0 : index
    %c0_6 = arith.constant 0 : index
    %6 = vector.load %arg3[%c0_5, %c0_6] : memref<8x1xf32, #tpu.memory_space<vmem>>, vector<8x1xf32>
    %7 = arith.addf %5, %6 : vector<8x1xf32>
    %cst_7 = arith.constant 0.000000e+00 : f32
    %8 = vector.broadcast %cst_7 : f32 to vector<8x1xf32>
    %9 = arith.maximumf %7, %8 : vector<8x1xf32>
    %c0_8 = arith.constant 0 : index
    %c0_9 = arith.constant 0 : index
    %10 = vector.load %arg4[%c0_8, %c0_9] : memref<128x8xf32, #tpu.memory_space<vmem>>, vector<128x8xf32>
    %cst_10 = arith.constant dense<0.000000e+00> : vector<128x1xf32>
    %11 = tpu.matmul %10, %9, %cst_10 {dimension_numbers = #tpu.dot_dimension_numbers<[1], [0], [0], [1], [0, 0, 1, 1], [], []>} : vector<128x8xf32>, vector<8x1xf32>, vector<128x1xf32> -> vector<128x1xf32>
    %c0_11 = arith.constant 0 : index
    %c0_12 = arith.constant 0 : index
    %12 = vector.load %arg5[%c0_11, %c0_12] : memref<128x1xf32, #tpu.memory_space<vmem>>, vector<128x1xf32>
    %13 = arith.addf %11, %12 : vector<128x1xf32>
    %14 = arith.negf %13 : vector<128x1xf32>
    %15 = math.exp %14 : vector<128x1xf32>
    %cst_13 = arith.constant 1.000000e+00 : f32
    %16 = vector.broadcast %cst_13 : f32 to vector<128x1xf32>
    %17 = arith.addf %16, %15 : vector<128x1xf32>
    %18 = arith.divf %16, %17 : vector<128x1xf32>
    %19 = vector.shape_cast %18 : vector<128x1xf32> to vector<1x128x1xf32>
    %20 = vector.broadcast %19 : vector<1x128x1xf32> to vector<1x128x256xf32>
    %21 = arith.mulf %0, %20 : vector<1x128x256xf32>
    %c0_14 = arith.constant 0 : index
    %c0_15 = arith.constant 0 : index
    %c0_16 = arith.constant 0 : index
    %22 = vector.load %arg6[%c0_14, %c0_15, %c0_16] : memref<1x128x256xf32, #tpu.memory_space<vmem>>, vector<1x128x256xf32>
    tpu.vector_store %arg6[%c0_14, %c0_15, %c0_16], %21 {strides = array<i32>} : memref<1x128x256xf32, #tpu.memory_space<vmem>>, vector<1x128x256xf32>,
    return
  }
  func.func @transform_0(%arg0: i32) -> (i32, i32, i32) {
    %c0_i32 = arith.constant 0 : i32
    %c0_i32_0 = arith.constant 0 : i32
    %c0_i32_1 = arith.constant 0 : i32
    return %arg0, %c0_i32, %c0_i32_0 : i32, i32, i32
  }
  func.func @transform_1(%arg0: i32) -> (i32, i32) {
    %c0_i32 = arith.constant 0 : i32
    %c0_i32_0 = arith.constant 0 : i32
    %c0_i32_1 = arith.constant 0 : i32
    return %c0_i32, %c0_i32_0 : i32, i32
  }
  func.func @transform_2(%arg0: i32) -> (i32, i32) {
    %c0_i32 = arith.constant 0 : i32
    %c0_i32_0 = arith.constant 0 : i32
    %c0_i32_1 = arith.constant 0 : i32
    return %c0_i32, %c0_i32_0 : i32, i32
  }
  func.func @transform_3(%arg0: i32) -> (i32, i32) {
    %c0_i32 = arith.constant 0 : i32
    %c0_i32_0 = arith.constant 0 : i32
    %c0_i32_1 = arith.constant 0 : i32
    return %c0_i32, %c0_i32_0 : i32, i32
  }
  func.func @transform_4(%arg0: i32) -> (i32, i32) {
    %c0_i32 = arith.constant 0 : i32
    %c0_i32_0 = arith.constant 0 : i32
    %c0_i32_1 = arith.constant 0 : i32
    return %c0_i32, %c0_i32_0 : i32, i32
  }
  func.func @transform_5(%arg0: i32) -> (i32, i32, i32) {
    %c0_i32 = arith.constant 0 : i32
    %c0_i32_0 = arith.constant 0 : i32
    %c0_i32_1 = arith.constant 0 : i32
    return %arg0, %c0_i32, %c0_i32_0 : i32, i32, i32
  }
}

</mosaic_0001>

<bundles_post_ra>
// kernel: channel_attention.1
= control target key start
LH: loop header
LB: loop body
LE: loop exit
PB: predicated region body
PF: predicated region fallthrough
CT: control target
= control target key end

     0   :  { %s1183_s18 = smov 0   ;;  %s1521_s0 = inlined_call_operand.vmem [shape: f32[2,128,256], index: 0, kind: input, shape index: {}]   ;;  %s1522_s1 = inlined_call_operand.vmem [shape: f32[8,128], index: 1, kind: input, shape index: {}]   ;;  %s1523_s2 = inlined_call_operand.vmem [shape: f32[8,1], index: 2, kind: input, shape index: {}]   ;;  %s1524_s3 = inlined_call_operand.vmem [shape: f32[128,8], index: 3, kind: input, shape index: {}]   ;;  %s1525_s4 = inlined_call_operand.vmem [shape: f32[128,1], index: 4, kind: input, shape index: {}]   ;;  %s1526_s5 = inlined_call_operand.vmem [shape: f32[2,128,256], index: 5, kind: output, shape index: {}]  }
   0x1 LB: > { %s899_s19 = sadd.s32 4294967295, %s1147_s18   ;;  %p903_p0 = scmp.ge.s32.totalorder %s1147_s18, 1  ;;  %s1147_s18 = sphi %s1183_s18, %s15_s18  }
   0x2   : > { %p187_p1 = scmp.lt.s32.totalorder %s1147_s18, 3 }
   0x4   : > { %p188_p2 = pnand %p903_p0, %p187_p1 }
   0x5   : > { %p215_p3 = scmp.lt.s32.totalorder (!%p188_p2), %s899_s19, 1  ;;  %v1149_v41 = vmov (!%p188_p2), 0.0|0.0   ;;  %vm1150_vm0 = vmmov (!%p188_p2), 0   ;;  %v1151_v49 = vmov (!%p188_p2), 0.0   ;;  %vm410_vm1 = vcmask (!%p188_p2), 64512  }
   0x6   : > { %191 = sbr.rel (%p188_p2) target bundleno = 828 (0x33c), region = 40  ;;  %1039 = vmatprep.subr.bf16.mxu0 (!%p188_p2), %v1149_v41  ;;  %1010 = vmatprep.mubr.msk.f32.mxu0 (!%p188_p2), %vm1150_vm0, %v1151_v49  ;;  %v379_v49 = vld [vmem:[%s1524_s3 + $0x8] sm:$0xff] (!%p188_p2) }
   0xd   : > { %s1528_s19 = smov (!%p215_p3, %s899_s19), 1 }
   0xe   : > { %s942_s20 = sshll.u32 %s1528_s19, 8 }
   0xf   : > { %s1199_s23 = scalar_lea.vmem %s1521_s0, %s942_s20  ;;  %s1452_s28 = scalar_lea.vmem %s1526_s5, %s942_s20 }
  0x10   : > { %v1202_v0 = vld [vmem:[%s1199_s23 + $0x20] sm:$0xff]  ;;  %v1205_v1 = vld [vmem:[%s1199_s23 + $0x28] sm:$0xff]  ;;  %v1216_v5 = vld [vmem:[%s1199_s23 + $0x30] sm:$0xff] }
  0x11   : > { %v1208_v2 = vld [vmem:[%s1199_s23] sm:$0xff]  ;;  %v263_v3 = vadd.f32 %v1205_v1, %v1202_v0  ;;  %v1213_v4 = vld [vmem:[%s1199_s23 + $0x8] sm:$0xff]  ;;  %v1219_v6 = vld [vmem:[%s1199_s23 + $0x38] sm:$0xff] }
  0x12   : > { %v257_v7 = vadd.f32 %v1213_v4, %v1208_v2  ;;  %v1224_v8 = vld [vmem:[%s1199_s23 + $0x10] sm:$0xff]  ;;  %v1227_v9 = vld [vmem:[%s1199_s23 + $0x18] sm:$0xff]  ;;  %v266_v10 = vadd.f32 %v1219_v6, %v1216_v5  ;;  %v1240_v14 = vld [vmem:[%s1199_s23 + $0x40] sm:$0xff] }
  0x13   : > { %264 = vadd.xlane.f32.xlu1 %v263_v3  ;;  %v260_v11 = vadd.f32 %v1227_v9, %v1224_v8  ;;  %v1234_v12 = vld [vmem:[%s1199_s23 + $0x50] sm:$0xff]  ;;  %v1237_v13 = vld [vmem:[%s1199_s23 + $0x58] sm:$0xff]  ;;  %v1243_v15 = vld [vmem:[%s1199_s23 + $0x48] sm:$0xff] }
  0x14   : > { %258 = vadd.xlane.f32.xlu0 %v257_v7  ;;  %v272_v16 = vadd.f32 %v1237_v13, %v1234_v12  ;;  %v269_v17 = vadd.f32 %v1243_v15, %v1240_v14  ;;  %v1250_v18 = vld [vmem:[%s1199_s23 + $0x70] sm:$0xff]  ;;  %v1253_v19 = vld [vmem:[%s1199_s23 + $0x78] sm:$0xff]  ;;  %v1256_v20 = vld [vmem:[%s1199_s23 + $0x60] sm:$0xff] }
  0x15   : > { %v1259_v21 = vld [vmem:[%s1199_s23 + $0x68] sm:$0xff]  ;;  %v278_v22 = vadd.f32 %v1253_v19, %v1250_v18  ;;  %v1266_v24 = vld [vmem:[%s1199_s23 + $0x90] sm:$0xff]  ;;  %v1269_v25 = vld [vmem:[%s1199_s23 + $0x98] sm:$0xff] }
  0x16   : > { %v275_v23 = vadd.f32 %v1259_v21, %v1256_v20  ;;  %v1272_v26 = vld [vmem:[%s1199_s23 + $0x80] sm:$0xff]  ;;  %v1275_v27 = vld [vmem:[%s1199_s23 + $0x88] sm:$0xff]  ;;  %v284_v28 = vadd.f32 %v1269_v25, %v1266_v24  ;;  %v1282_v30 = vld [vmem:[%s1199_s23 + $0xb0] sm:$0xff] }
  0x17   : > { %267 = vadd.xlane.f32.xlu1 %v266_v10  ;;  %v281_v29 = vadd.f32 %v1275_v27, %v1272_v26  ;;  %v1285_v31 = vld [vmem:[%s1199_s23 + $0xb8] sm:$0xff]  ;;  %v1288_v32 = vld [vmem:[%s1199_s23 + $0xa0] sm:$0xff]  ;;  %v1291_v33 = vld [vmem:[%s1199_s23 + $0xa8] sm:$0xff] }
  0x18   : > { %261 = vadd.xlane.f32.xlu0 %v260_v11  ;;  %v290_v34 = vadd.f32 %v1285_v31, %v1282_v30  ;;  %v287_v35 = vadd.f32 %v1291_v33, %v1288_v32  ;;  %v1298_v36 = vld [vmem:[%s1199_s23 + $0xd0] sm:$0xff]  ;;  %v1301_v37 = vld [vmem:[%s1199_s23 + $0xd8] sm:$0xff]  ;;  %v1304_v38 = vld [vmem:[%s1199_s23 + $0xc0] sm:$0xff] }
  0x19   : > { %v1307_v39 = vld [vmem:[%s1199_s23 + $0xc8] sm:$0xff]  ;;  %v296_v40 = vadd.f32 %v1301_v37, %v1298_v36  ;;  %v1314_v43 = vld [vmem:[%s1199_s23 + $0xf0] sm:$0xff]  ;;  %v1317_v44 = vld [vmem:[%s1199_s23 + $0xf8] sm:$0xff] }
  0x1a   : > { %v293_v42 = vadd.f32 %v1307_v39, %v1304_v38  ;;  %v1320_v45 = vld [vmem:[%s1199_s23 + $0xe0] sm:$0xff]  ;;  %v1323_v46 = vld [vmem:[%s1199_s23 + $0xe8] sm:$0xff]  ;;  %v302_v47 = vadd.f32 %v1317_v44, %v1314_v43 }
  0x1b   : > { %273 = vadd.xlane.f32.xlu1 %v272_v16  ;;  %v299_v48 = vadd.f32 %v1323_v46, %v1320_v45 }
  0x1c   : > { %270 = vadd.xlane.f32.xlu0 %v269_v17 }
  0x1f   : > { %279 = vadd.xlane.f32.xlu1 %v278_v22 }
  0x20   : > { %276 = vadd.xlane.f32.xlu0 %v275_v23 }
  0x23   : > { %285 = vadd.xlane.f32.xlu1 %v284_v28 }
  0x24   : > { %282 = vadd.xlane.f32.xlu0 %v281_v29 }
  0x27   : > { %291 = vadd.xlane.f32.xlu1 %v290_v34  ;;  %v305_v34 = vld [vmem:[%s1522_s1] sm:$0xff] }
  0x28   : > { %288 = vadd.xlane.f32.xlu0 %v287_v35  ;;  %v378_v35 = vld [vmem:[%s1524_s3] sm:$0xff] }
  0x29   : > { %1015 = vmatprep.mubr.msk.f32.mxu1 %vm410_vm1, %v378_v35 }
  0x2b   : > { %297 = vadd.xlane.f32.xlu1 %v296_v40  ;;  %v306_v40 = vld [vmem:[%s1523_s2] sm:$0xff] }
  0x2c   : > { %294 = vadd.xlane.f32.xlu0 %v293_v42 }
  0x2f   : > { %303 = vadd.xlane.f32.xlu1 %v302_v47 }
  0x30   : > { %300 = vadd.xlane.f32.xlu0 %v299_v48 }
  0xa0   : > { %v265_v50 = vpop.xlane.xlu1 %264 }
  0xa1   : > { %v259_v51 = vpop.xlane.xlu0 %258 }
  0xa4   : > { %v268_v52 = vpop.xlane.xlu1 %267 }
  0xa5   : > { %v262_v53 = vpop.xlane.xlu0 %261  ;;  %v1043_v57 = vpack.c.bf16 %v268_v52, %v265_v50  ;;  %v380_v50 = vld [vmem:[%s1524_s3 + $0x10] sm:$0xff]  ;;  %v382_v52 = vld [vmem:[%s1524_s3 + $0x20] sm:$0xff] }
  0xa6   : > { %v1040_v54 = vpack.c.bf16 %v262_v53, %v259_v51  ;;  %v381_v51 = vld [vmem:[%s1524_s3 + $0x18] sm:$0xff]  ;;  %v383_v53 = vld [vmem:[%s1524_s3 + $0x28] sm:$0xff] }
  0xa8   : > { %1041 = vmatpush3.bf16.msra.mxu0 %v1040_v54  ;;  %v274_v55 = vpop.xlane.xlu1 %273  ;;  %v384_v54 = vld [vmem:[%s1524_s3 + $0x30] sm:$0xff] }
  0xa9   : > { %1042 = vmatprep.subr.bf16.mxu0 %v1149_v41  ;;  %v271_v56 = vpop.xlane.xlu0 %270 }
  0xaa   : > { %v1046_v58 = vpack.c.bf16 %v274_v55, %v271_v56  ;;  %v385_v55 = vld [vmem:[%s1524_s3 + $0x38] sm:$0xff]  ;;  %v386_v56 = vld [vmem:[%s1524_s3 + $0x40] sm:$0xff] }
  0xac   : > { %1044 = vmatpush3.bf16.msra.mxu0 %v1043_v57  ;;  %v280_v59 = vpop.xlane.xlu1 %279  ;;  %v387_v57 = vld [vmem:[%s1524_s3 + $0x48] sm:$0xff] }
  0xad   : > { %1045 = vmatprep.subr.bf16.mxu0 %v1149_v41  ;;  %v277_v60 = vpop.xlane.xlu0 %276 }
  0xae   : > { %v1049_v61 = vpack.c.bf16 %v280_v59, %v277_v60  ;;  %v389_v59 = vld [vmem:[%s1524_s3 + $0x58] sm:$0xff]  ;;  %v390_v60 = vld [vmem:[%s1524_s3 + $0x60] sm:$0xff] }
  0xb0   : > { %1047 = vmatpush3.bf16.msra.mxu0 %v1046_v58  ;;  %v286_v62 = vpop.xlane.xlu1 %285  ;;  %v388_v58 = vld [vmem:[%s1524_s3 + $0x50] sm:$0xff] }
  0xb1   : > { %1048 = vmatprep.subr.bf16.mxu0 %v1149_v41  ;;  %v283_v63 = vpop.xlane.xlu0 %282 }
  0xb2   : > { %v1052_v3 = vpack.c.bf16 %v286_v62, %v283_v63  ;;  %v392_v62 = vld [vmem:[%s1524_s3 + $0x70] sm:$0xff]  ;;  %v393_v63 = vld [vmem:[%s1524_s3 + $0x78] sm:$0xff] }
  0xb4   : > { %1050 = vmatpush3.bf16.msra.mxu0 %v1049_v61  ;;  %v292_v7 = vpop.xlane.xlu1 %291  ;;  %v391_v61 = vld [vmem:[%s1524_s3 + $0x68] sm:$0xff] }
  0xb5   : > { %1051 = vmatprep.subr.bf16.mxu0 %v1149_v41  ;;  %v289_v10 = vpop.xlane.xlu0 %288 }
  0xb6   : > { %v1055_v11 = vpack.c.bf16 %v292_v7, %v289_v10  ;;  %v395_v7 = vld [vmem:[%s1525_s4 + $0x8] sm:$0xff]  ;;  %v394_v10 = vld [vmem:[%s1525_s4] sm:$0xff] }
  0xb8   : > { %1053 = vmatpush3.bf16.msra.mxu0 %v1052_v3  ;;  %v298_v16 = vpop.xlane.xlu1 %297  ;;  %v1152_v3 = vmov 0  }
  0xb9   : > { %1054 = vmatprep.subr.bf16.mxu0 %v1149_v41  ;;  %v295_v17 = vpop.xlane.xlu0 %294  ;;  %1075 = vset.pattern.permute.xlu1 %v1152_v3 }
  0xba   : > { %v1058_v22 = vpack.c.bf16 %v298_v16, %v295_v17  ;;  %1076 = vset.pattern.permute.xlu0 %v1152_v3 }
  0xbc   : > { %1056 = vmatpush3.bf16.msra.mxu0 %v1055_v11  ;;  %v304_v23 = vpop.xlane.xlu1 %303 }
  0xbd   : > { %1057 = vmatprep.subr.bf16.mxu0 %v1149_v41  ;;  %v301_v28 = vpop.xlane.xlu0 %300 }
  0xbe   : > { %v1061_v29 = vpack.c.bf16 %v304_v23, %v301_v28  ;;  %v397_v23 = vld [vmem:[%s1525_s4 + $0x18] sm:$0xff] }
  0xc0   : > { %1059 = vmatpush3.bf16.msra.mxu0 %v1058_v22 }
  0xc1   : > { %1060 = vmatprep.subr.bf16.mxu0 %v1149_v41 }
  0xc4   : > { %1062 = vmatpush3.bf16.msra.mxu0 %v1061_v29  ;;  %v396_v29 = vld [vmem:[%s1525_s4 + $0x10] sm:$0xff] }
  0xc7   : > { %1011 = vmatmul.mubr.f32.vlgmr.msra.gmra.mrb[0].mxu0 %v305_v34 }
 0x19a   : > { %v373_v42 = vpop.f32.mrb[0].mxu0 }
 0x19b   : > { %v374_v47 = vadd.f32 %v373_v42, %v306_v40  ;;  %v1012_v41 = vpop.f32.mrb[1].mxu0 }
 0x19c   : > { %v399_v41 = vld [vmem:[%s1525_s4 + $0x28] sm:$0xff] }
 0x19d   : > { %v377_v48 = vmax.f32 %v374_v47, 0.0 }
 0x19f   : > { %1013 = vmatprep.subr.mxu1 %v377_v48 }
 0x1a0   : > { %1014 = vmatpush3.msra.mxu1 %v377_v48 }
 0x1a1   : > { %1016 = vmatmul.mubr.msk.f32.vlgmr.msra.gmra.mrb[0].mxu1 %vm410_vm1, %v379_v49  ;;  %v398_v49 = vld [vmem:[%s1525_s4 + $0x20] sm:$0xff] }
 0x1a2   : > { %1018 = vmatprep.mubr.msk.f32.mxu1 %vm410_vm1, %v380_v50 }
 0x1a5   : > { %1019 = vmatmul.mubr.msk.f32.gmra.mrb[2].mxu1 %vm410_vm1, %v381_v51 }
 0x1a6   : > { %1021 = vmatprep.mubr.msk.f32.mxu1 %vm410_vm1, %v382_v52 }
 0x1a9   : > { %1022 = vmatmul.mubr.msk.f32.gmra.mrb[4].mxu1 %vm410_vm1, %v383_v53 }
 0x1aa   : > { %1024 = vmatprep.mubr.msk.f32.mxu1 %vm410_vm1, %v384_v54 }
 0x1ad   : > { %1025 = vmatmul.mubr.msk.f32.gmra.mrb[6].mxu1 %vm410_vm1, %v385_v55  ;;  %v401_v55 = vld [vmem:[%s1525_s4 + $0x38] sm:$0xff] }
 0x1ae   : > { %1027 = vmatprep.mubr.msk.f32.mxu1 %vm410_vm1, %v386_v56 }
 0x1b1   : > { %1028 = vmatmul.mubr.msk.f32.gmra.mrb[8].mxu1 %vm410_vm1, %v387_v57 }
 0x1b2   : > { %1030 = vmatprep.mubr.msk.f32.mxu1 %vm410_vm1, %v388_v58 }
 0x1b5   : > { %1031 = vmatmul.mubr.msk.f32.gmra.mrb[10].mxu1 %vm410_vm1, %v389_v59 }
 0x1b6   : > { %1033 = vmatprep.mubr.msk.f32.mxu1 %vm410_vm1, %v390_v60 }
 0x1b9   : > { %1034 = vmatmul.mubr.msk.f32.gmra.mrb[12].mxu1 %vm410_vm1, %v391_v61  ;;  %v400_v61 = vld [vmem:[%s1525_s4 + $0x30] sm:$0xff] }
 0x1ba   : > { %1036 = vmatprep.mubr.msk.f32.mxu1 %vm410_vm1, %v392_v62  ;;  %v403_v62 = vld [vmem:[%s1525_s4 + $0x48] sm:$0xff] }
 0x1bd   : > { %1037 = vmatmul.mubr.msk.f32.gmra.mrb[14].mxu1 %vm410_vm1, %v393_v63 }
 0x274   : > { %v1017_v11 = vpop.f32.mrb[0].mxu1 }
 0x275   : > { %v531_v16 = vadd.f32 %v1017_v11, %v395_v7  ;;  %v525_v17 = vpop.f32.mrb[1].mxu1 }
 0x276   : > { %v526_v22 = vadd.f32 %v525_v17, %v394_v10  ;;  %v402_v17 = vld [vmem:[%s1525_s4 + $0x40] sm:$0xff] }
 0x277   : > { %v925_v28 = vmul.f32 -1.442695, %v531_v16 }
 0x278   : > { %v924_v34 = vmul.f32 -1.442695, %v526_v22  ;;  %v1020_v35 = vpop.f32.mrb[2].mxu1 }
 0x279   : > { %1077 = vpow2.f32 %v925_v28  ;;  %v541_v40 = vadd.f32 %v1020_v35, %v397_v23  ;;  %v535_v42 = vpop.f32.mrb[3].mxu1 }
 0x27a   : > { %1079 = vpow2.f32 %v924_v34  ;;  %v536_v47 = vadd.f32 %v535_v42, %v396_v29  ;;  %v405_v29 = vld [vmem:[%s1525_s4 + $0x58] sm:$0xff]  ;;  %v404_v42 = vld [vmem:[%s1525_s4 + $0x50] sm:$0xff] }
 0x27b   : > { %v927_v48 = vmul.f32 -1.442695, %v541_v40 }
 0x27c   : > { %v926_v50 = vmul.f32 -1.442695, %v536_v47  ;;  %v1023_v51 = vpop.f32.mrb[4].mxu1 }
 0x27d   : > { %1081 = vpow2.f32 %v927_v48  ;;  %v551_v52 = vadd.f32 %v1023_v51, %v399_v41  ;;  %v545_v53 = vpop.f32.mrb[5].mxu1 }
 0x27e   : > { %1083 = vpow2.f32 %v926_v50  ;;  %v546_v54 = vadd.f32 %v545_v53, %v398_v49 }
 0x27f   : > { %v929_v56 = vmul.f32 -1.442695, %v551_v52 }
 0x280   : > { %v928_v57 = vmul.f32 -1.442695, %v546_v54  ;;  %v1026_v58 = vpop.f32.mrb[6].mxu1  ;;  %v407_v54 = vld [vmem:[%s1525_s4 + $0x68] sm:$0xff] }
 0x281   : > { %1085 = vpow2.f32 %v929_v56  ;;  %v561_v59 = vadd.f32 %v1026_v58, %v401_v55  ;;  %v555_v60 = vpop.f32.mrb[7].mxu1  ;;  %v406_v58 = vld [vmem:[%s1525_s4 + $0x60] sm:$0xff] }
 0x282   : > { %1087 = vpow2.f32 %v928_v57  ;;  %v556_v11 = vadd.f32 %v555_v60, %v400_v61 }
 0x283   : > { %v1078_v63 = vpop.eup %1077  ;;  %v931_v3 = vmul.f32 -1.442695, %v561_v59 }
 0x284   : > { %v1080_v7 = vpop.eup %1079  ;;  %v653_v10 = vadd.f32 1.0, %v1078_v63  ;;  %v1029_v16 = vpop.f32.mrb[8].mxu1  ;;  %v930_v48 = vmul.f32 -1.442695, %v556_v11 }
 0x285   : > { %v652_v22 = vadd.f32 1.0, %v1080_v7  ;;  %1089 = vpow2.f32 %v931_v3  ;;  %v571_v23 = vadd.f32 %v1029_v16, %v403_v62  ;;  %v565_v28 = vpop.f32.mrb[9].mxu1 }
 0x286   : > { %1091 = vrcp.f32 %v653_v10  ;;  %v566_v40 = vadd.f32 %v565_v28, %v402_v17  ;;  %v409_v10 = vld [vmem:[%s1525_s4 + $0x78] sm:$0xff]  ;;  %v408_v28 = vld [vmem:[%s1525_s4 + $0x70] sm:$0xff] }
 0x287   : > { %v1082_v34 = vpop.eup %1081  ;;  %1093 = vrcp.f32 %v652_v22  ;;  %v933_v35 = vmul.f32 -1.442695, %v571_v23 }
 0x288   : > { %v1084_v47 = vpop.eup %1083  ;;  %v655_v41 = vadd.f32 1.0, %v1082_v34  ;;  %v1032_v49 = vpop.f32.mrb[10].mxu1  ;;  %v932_v56 = vmul.f32 -1.442695, %v566_v40 }
 0x289   : > { %1095 = vpow2.f32 %v933_v35  ;;  %v581_v50 = vadd.f32 %v1032_v49, %v405_v29  ;;  %v575_v51 = vpop.f32.mrb[11].mxu1  ;;  %v654_v52 = vadd.f32 1.0, %v1084_v47 }
 0x28a   : > { %1097 = vrcp.f32 %v655_v41  ;;  %v576_v53 = vadd.f32 %v575_v51, %v404_v42 }
 0x28b   : > { %v1086_v55 = vpop.eup %1085  ;;  %v935_v57 = vmul.f32 -1.442695, %v581_v50  ;;  %1099 = vpow2.f32 %v930_v48 }
 0x28c   : > { %v657_v59 = vadd.f32 1.0, %v1086_v55  ;;  %v1035_v60 = vpop.f32.mrb[12].mxu1  ;;  %v1088_v61 = vpop.eup %1087  ;;  %v934_v3 = vmul.f32 -1.442695, %v576_v53 }
 0x28d   : > { %1101 = vpow2.f32 %v935_v57  ;;  %v591_v62 = vadd.f32 %v1035_v60, %v407_v54  ;;  %v585_v63 = vpop.f32.mrb[13].mxu1  ;;  %v656_v22 = vadd.f32 1.0, %v1088_v61 }
 0x28e   : > { %1103 = vrcp.f32 %v654_v52  ;;  %v586_v7 = vadd.f32 %v585_v63, %v406_v58 }
 0x28f   : > { %v1090_v11 = vpop.eup %1089  ;;  %1105 = vpow2.f32 %v932_v56  ;;  %v937_v16 = vmul.f32 -1.442695, %v591_v62 }
 0x290   : > { %v1092_v17 = vpop.eup %1091  ;;  %1107 = vrcp.f32 %v657_v59  ;;  %v1038_v23 = vpop.f32.mrb[14].mxu1  ;;  %v936_v34 = vmul.f32 -1.442695, %v586_v7  ;;  %v659_v49 = vadd.f32 1.0, %v1090_v11 }
 0x291   : > { %v1094_v29 = vpop.eup %1093  ;;  %1109 = vpow2.f32 %v937_v16  ;;  %v601_v35 = vadd.f32 %v1038_v23, %v409_v10  ;;  %707 = vperm.xlu1 %1075, %v1092_v17   ;;  %v595_v40 = vpop.f32.mrb[15].mxu1 }
 0x292   : > { %1111 = vpow2.f32 %v934_v3  ;;  %702 = vperm.xlu0 %1076, %v1094_v29   ;;  %v596_v41 = vadd.f32 %v595_v40, %v408_v28 }
 0x293   : > { %v1096_v42 = vpop.eup %1095  ;;  %v939_v47 = vmul.f32 -1.442695, %v601_v35  ;;  %1113 = vrcp.f32 %v656_v22 }
 0x294   : > { %v1098_v48 = vpop.eup %1097  ;;  %v661_v50 = vadd.f32 1.0, %v1096_v42  ;;  %1115 = vpow2.f32 %v936_v34  ;;  %v938_v53 = vmul.f32 -1.442695, %v596_v41 }
 0x295   : > { %717 = vperm.xlu1 %1075, %v1098_v48   ;;  %v1100_v51 = vpop.eup %1099 }
 0x296   : > { %1117 = vrcp.f32 %v661_v50  ;;  %v658_v57 = vadd.f32 1.0, %v1100_v51 }
 0x297   : > { %v1102_v52 = vpop.eup %1101  ;;  %1119 = vpow2.f32 %v939_v47 }
 0x298   : > { %v1104_v54 = vpop.eup %1103  ;;  %1121 = vrcp.f32 %v659_v49  ;;  %v663_v55 = vadd.f32 1.0, %v1102_v52 }
 0x299   : > { %v1106_v56 = vpop.eup %1105  ;;  %712 = vperm.xlu1 %1075, %v1104_v54  }
 0x29a   : > { %v1108_v58 = vpop.eup %1107  ;;  %1123 = vrcp.f32 %v663_v55  ;;  %v660_v61 = vadd.f32 1.0, %v1106_v56 }
 0x29b   : > { %v1110_v59 = vpop.eup %1109  ;;  %1125 = vpow2.f32 %v938_v53 }
 0x29c   : > { %v1112_v60 = vpop.eup %1111  ;;  %v665_v62 = vadd.f32 1.0, %v1110_v59  ;;  %1127 = vrcp.f32 %v658_v57 }
 0x29d   : > { %727 = vperm.xlu1 %1075, %v1108_v58   ;;  %v1114_v63 = vpop.eup %1113  ;;  %v662_v7 = vadd.f32 1.0, %v1112_v60 }
 0x29e   : > { %1129 = vrcp.f32 %v665_v62  ;;  %v1116_v3 = vpop.eup %1115 }
 0x29f   : > { %1131 = vrcp.f32 %v660_v61  ;;  %v664_v23 = vadd.f32 1.0, %v1116_v3 }
 0x2a0   : > { %v1118_v10 = vpop.eup %1117  ;;  %1133 = vrcp.f32 %v662_v7 }
 0x2a1   : > { %v1120_v11 = vpop.eup %1119  ;;  %722 = vperm.xlu1 %1075, %v1114_v63   ;;  %747 = vperm.xlu0 %1076, %v1118_v10  }
 0x2a2   : > { %v1122_v16 = vpop.eup %1121  ;;  %v667_v17 = vadd.f32 1.0, %v1120_v11 }
 0x2a4   : > { %v1124_v22 = vpop.eup %1123  ;;  %1135 = vrcp.f32 %v667_v17 }
 0x2a5   : > { %v1126_v28 = vpop.eup %1125  ;;  %737 = vperm.xlu1 %1075, %v1122_v16   ;;  %757 = vperm.xlu0 %1076, %v1124_v22   ;;  %1137 = vrcp.f32 %v664_v23 }
 0x2a6   : > { %v1128_v29 = vpop.eup %1127  ;;  %v666_v35 = vadd.f32 1.0, %v1126_v28 }
 0x2a8   : > { %v1130_v34 = vpop.eup %1129  ;;  %1139 = vrcp.f32 %v666_v35 }
 0x2a9   : > { %732 = vperm.xlu1 %1075, %v1128_v29   ;;  %767 = vperm.xlu0 %1076, %v1130_v34   ;;  %v1132_v40 = vpop.eup %1131 }
 0x2aa   : > { %v1134_v42 = vpop.eup %1133 }
 0x2ad   : > { %742 = vperm.xlu1 %1075, %v1132_v40  }
 0x2ae   : > { %v1136_v47 = vpop.eup %1135 }
 0x2af   : > { %777 = vperm.xlu0 %1076, %v1136_v47   ;;  %v1138_v41 = vpop.eup %1137 }
 0x2b1   : > { %752 = vperm.xlu1 %1075, %v1134_v42  }
 0x2b2   : > { %v1140_v48 = vpop.eup %1139 }
 0x2b5   : > { %762 = vperm.xlu1 %1075, %v1138_v41  }
 0x2b9   : > { %772 = vperm.xlu1 %1075, %v1140_v48  }
 0x310   : > { %v708_v49 = vpop.permute.xlu1 %707 }
 0x311   : > { %v782_v50 = vmul.f32 %v708_v49, %v1224_v8  ;;  %v783_v51 = vmul.f32 %v708_v49, %v1227_v9  ;;  %v703_v52 = vpop.permute.xlu0 %702 }
 0x312   : > { %v780_v53 = vmul.f32 %v703_v52, %v1208_v2  ;;  %v781_v54 = vmul.f32 %v703_v52, %v1213_v4 }
 0x313   : > { %814 = vst [vmem:[%s1452_s28 + $0x10] sm:$0xff] %v782_v50  ;;  %815 = vst [vmem:[%s1452_s28 + $0x18] sm:$0xff] %v783_v51 }
 0x314   : > { %812 = vst [vmem:[%s1452_s28] sm:$0xff] %v780_v53  ;;  %813 = vst [vmem:[%s1452_s28 + $0x8] sm:$0xff] %v781_v54  ;;  %v718_v55 = vpop.permute.xlu1 %717 }
 0x315   : > { %v786_v56 = vmul.f32 %v718_v55, %v1216_v5  ;;  %v787_v8 = vmul.f32 %v718_v55, %v1219_v6 }
 0x317   : > { %818 = vst [vmem:[%s1452_s28 + $0x30] sm:$0xff] %v786_v56  ;;  %819 = vst [vmem:[%s1452_s28 + $0x38] sm:$0xff] %v787_v8 }
 0x318   : > { %v713_v9 = vpop.permute.xlu1 %712 }
 0x319   : > { %v784_v57 = vmul.f32 %v713_v9, %v1202_v0  ;;  %v785_v2 = vmul.f32 %v713_v9, %v1205_v1 }
 0x31b   : > { %816 = vst [vmem:[%s1452_s28 + $0x20] sm:$0xff] %v784_v57  ;;  %817 = vst [vmem:[%s1452_s28 + $0x28] sm:$0xff] %v785_v2 }
 0x31c   : > { %v728_v4 = vpop.permute.xlu1 %727 }
 0x31d   : > { %v790_v58 = vmul.f32 %v728_v4, %v1234_v12  ;;  %v791_v5 = vmul.f32 %v728_v4, %v1237_v13 }
 0x31f   : > { %822 = vst [vmem:[%s1452_s28 + $0x50] sm:$0xff] %v790_v58  ;;  %823 = vst [vmem:[%s1452_s28 + $0x58] sm:$0xff] %v791_v5 }
 0x320   : > { %v723_v6 = vpop.permute.xlu1 %722  ;;  %v748_v59 = vpop.permute.xlu0 %747 }
 0x321   : > { %v788_v0 = vmul.f32 %v723_v6, %v1240_v14  ;;  %v789_v1 = vmul.f32 %v723_v6, %v1243_v15  ;;  %v798_v60 = vmul.f32 %v748_v59, %v1266_v24  ;;  %v799_v61 = vmul.f32 %v748_v59, %v1269_v25 }
 0x323   : > { %820 = vst [vmem:[%s1452_s28 + $0x40] sm:$0xff] %v788_v0  ;;  %821 = vst [vmem:[%s1452_s28 + $0x48] sm:$0xff] %v789_v1 }
 0x324   : > { %830 = vst [vmem:[%s1452_s28 + $0x90] sm:$0xff] %v798_v60  ;;  %831 = vst [vmem:[%s1452_s28 + $0x98] sm:$0xff] %v799_v61  ;;  %v738_v12 = vpop.permute.xlu1 %737  ;;  %v758_v13 = vpop.permute.xlu0 %757 }
 0x325   : > { %v794_v62 = vmul.f32 %v738_v12, %v1250_v18  ;;  %v795_v14 = vmul.f32 %v738_v12, %v1253_v19  ;;  %v802_v15 = vmul.f32 %v758_v13, %v1282_v30  ;;  %v803_v24 = vmul.f32 %v758_v13, %v1285_v31 }
 0x327   : > { %826 = vst [vmem:[%s1452_s28 + $0x70] sm:$0xff] %v794_v62  ;;  %827 = vst [vmem:[%s1452_s28 + $0x78] sm:$0xff] %v795_v14 }
 0x328   : > { %834 = vst [vmem:[%s1452_s28 + $0xb0] sm:$0xff] %v802_v15  ;;  %835 = vst [vmem:[%s1452_s28 + $0xb8] sm:$0xff] %v803_v24  ;;  %v733_v25 = vpop.permute.xlu1 %732  ;;  %v768_v63 = vpop.permute.xlu0 %767 }
 0x329   : > { %v792_v3 = vmul.f32 %v733_v25, %v1256_v20  ;;  %v793_v18 = vmul.f32 %v733_v25, %v1259_v21  ;;  %v806_v19 = vmul.f32 %v768_v63, %v1298_v36  ;;  %v807_v30 = vmul.f32 %v768_v63, %v1301_v37 }
 0x32b   : > { %824 = vst [vmem:[%s1452_s28 + $0x60] sm:$0xff] %v792_v3  ;;  %825 = vst [vmem:[%s1452_s28 + $0x68] sm:$0xff] %v793_v18 }
 0x32c   : > { %838 = vst [vmem:[%s1452_s28 + $0xd0] sm:$0xff] %v806_v19  ;;  %839 = vst [vmem:[%s1452_s28 + $0xd8] sm:$0xff] %v807_v30  ;;  %v743_v31 = vpop.permute.xlu1 %742 }
 0x32d   : > { %v796_v7 = vmul.f32 %v743_v31, %v1272_v26  ;;  %v797_v10 = vmul.f32 %v743_v31, %v1275_v27 }
 0x32e   : > { %v778_v20 = vpop.permute.xlu0 %777 }
 0x32f   : > { %828 = vst [vmem:[%s1452_s28 + $0x80] sm:$0xff] %v796_v7  ;;  %829 = vst [vmem:[%s1452_s28 + $0x88] sm:$0xff] %v797_v10  ;;  %v810_v21 = vmul.f32 %v778_v20, %v1314_v43  ;;  %v811_v36 = vmul.f32 %v778_v20, %v1317_v44 }
 0x330   : > { %v753_v37 = vpop.permute.xlu1 %752 }
 0x331   : > { %842 = vst [vmem:[%s1452_s28 + $0xf0] sm:$0xff] %v810_v21  ;;  %843 = vst [vmem:[%s1452_s28 + $0xf8] sm:$0xff] %v811_v36  ;;  %v800_v11 = vmul.f32 %v753_v37, %v1288_v32  ;;  %v801_v26 = vmul.f32 %v753_v37, %v1291_v33 }
 0x333   : > { %832 = vst [vmem:[%s1452_s28 + $0xa0] sm:$0xff] %v800_v11  ;;  %833 = vst [vmem:[%s1452_s28 + $0xa8] sm:$0xff] %v801_v26 }
 0x334   : > { %v763_v27 = vpop.permute.xlu1 %762 }
 0x335   : > { %v804_v16 = vmul.f32 %v763_v27, %v1304_v38  ;;  %v805_v17 = vmul.f32 %v763_v27, %v1307_v39 }
 0x337   : > { %836 = vst [vmem:[%s1452_s28 + $0xc0] sm:$0xff] %v804_v16  ;;  %837 = vst [vmem:[%s1452_s28 + $0xc8] sm:$0xff] %v805_v17 }
 0x338   : > { %v773_v43 = vpop.permute.xlu1 %772 }
 0x339   : > { %v808_v44 = vmul.f32 %v773_v43, %v1320_v45  ;;  %v809_v22 = vmul.f32 %v773_v43, %v1323_v46 }
 0x33b   : > { %840 = vst [vmem:[%s1452_s28 + $0xe0] sm:$0xff] %v808_v44  ;;  %841 = vst [vmem:[%s1452_s28 + $0xe8] sm:$0xff] %v809_v22 }
 0x33c PF: > { %s15_s18 = sadd.s32 1, %s1147_s18  }
 0x33d   : > { %p12_p4 = scmp.ge.s32.totalorder %s15_s18, 4  }
 0x33f   :  { %14 = sbr.rel (!%p12_p4) target bundleno = 1 (0x1), region = 70 }

</bundles_post_ra>
